<compile_context>
chip_gen: v7x
topology: tpu7x:2x2x1
jax: 0.10.0
libtpu: 0.0.40
codegen_flags: <defaults>
</compile_context>

<pallas_src>
import functools

import numpy as np

import jax
import jax.numpy as jnp
from jax.experimental import pallas as pl
from jax.experimental.pallas import tpu as pltpu


def _round_up(x, m):
    return ((x + m - 1) // m) * m


# -----------------------------------------------------------------------------
# Prep kernel: normalize, fold 1/sqrt(temp), cast, emit LHS + transposed RHS + p.
# Grid = (view v in {0,1}, row tile i).  Both views' tiles are loaded each step
# (tiny) so the partner logit can be computed; exactly one view is written out.
# -----------------------------------------------------------------------------
def _prep_kernel(f0_ref, f1_ref, a_ref, at_ref, p_ref, *, inv_sqrt_temp, out_dtype):
    v = pl.program_id(0)
    x0 = f0_ref[...].astype(jnp.float32)
    x1 = f1_ref[...].astype(jnp.float32)
    # F.normalize(dim=1): x / max(||x||, 1e-12) == x * rsqrt(max(||x||^2, 1e-24)).
    inv0 = jax.lax.rsqrt(jnp.maximum(jnp.sum(x0 * x0, axis=1, keepdims=True), 1e-24))
    inv1 = jax.lax.rsqrt(jnp.maximum(jnp.sum(x1 * x1, axis=1, keepdims=True), 1e-24))
    a0 = x0 * (inv0 * inv_sqrt_temp)                     # xn0 / sqrt(temp)
    a1 = x1 * (inv1 * inv_sqrt_temp)                     # xn1 / sqrt(temp)

    # Partner logit p = sim(xn0, xn1)/temp, computed from the *cast* operands so it
    # matches (up to accumulation order) the MXU value of the same matrix entry.
    a0c = a0.astype(out_dtype).astype(jnp.float32)
    a1c = a1.astype(out_dtype).astype(jnp.float32)
    p_ref[...] = jnp.sum(a0c * a1c, axis=1, keepdims=True)

    @pl.when(v == 0)
    def _write_view0():
        a_ref[...] = a0.astype(out_dtype)
        at_ref[...] = a0.T.astype(out_dtype)     # f32 transpose (XLU), then cast

    @pl.when(v == 1)
    def _write_view1():
        a_ref[...] = a1.astype(out_dtype)
        at_ref[...] = a1.T.astype(out_dtype)


# -----------------------------------------------------------------------------
# Main kernel: streaming exp(sim/temp - shift) over column tiles, per-row
# denominator accumulation, log-domain per-row loss at the last column tile.
# -----------------------------------------------------------------------------
def _sim_loss_kernel(a_ref, bt_ref, p_ref, loss_ref, denom_acc, *,
                     shift, tile, resident, need_col_mask, jpad0, jpad1,
                     n_valid_tail):
    i = pl.program_id(0)
    j = pl.program_id(1)

    @pl.when(j == 0)
    def _init():
        denom_acc[...] = jnp.zeros_like(denom_acc)

    if resident:
        # RHS lives fully in VMEM; take the current 128-aligned column slab.
        c0 = pl.multiple_of(j * tile, 128)
        b = bt_ref[:, pl.ds(c0, tile)]
    else:
        b = bt_ref[...]

    # (tile, Dp) @ (Dp, tile) on the MXU; temperature already folded into operands.
    s = jnp.dot(a_ref[...], b, preferred_element_type=jnp.float32)
    e = jnp.exp(s - shift)                                # overflow-proof (s <= shift)

    denom_acc[...] += jnp.sum(e, axis=1, keepdims=True)

    # Remove self-similarity exactly: with tm == tk the global diagonal only lives in
    # column tile j == i (one masked pass per row tile).
    @pl.when(j == i)
    def _drop_diag():
        r = jax.lax.broadcasted_iota(jnp.int32, e.shape, 0)
        c = jax.lax.broadcasted_iota(jnp.int32, e.shape, 1)
        denom_acc[...] -= jnp.sum(jnp.where(r == c, e, 0.0), axis=1, keepdims=True)

    if need_col_mask:  # static: only traced when per-view rows were padded
        # Padded columns only exist in the last column tile of each half.
        @pl.when((j == jpad0) | (j == jpad1))
        def _drop_pad_cols():
            c = jax.lax.broadcasted_iota(jnp.int32, e.shape, 1)
            denom_acc[...] -= jnp.sum(jnp.where(c >= n_valid_tail, e, 0.0),
                                      axis=1, keepdims=True)

    @pl.when(j == pl.num_programs(1) - 1)
    def _finalize():
        # loss = -log(exp(p)/denom) = log(denom_shifted) + shift - p
        loss_ref[...] = jnp.log(denom_acc[...]) + shift - p_ref[...]


# -----------------------------------------------------------------------------
# Wrapper: tiny XLA glue (reshape + zero-pad of the raw views) + the two pallas_calls.
# -----------------------------------------------------------------------------
def seqclr_loss(features0, features1, temp=0.1, reduction='batchmean',
                matmul_dtype=jnp.bfloat16, _force_stream=False):
    """JAX/Pallas equivalent of SeqCLRLoss.forward.

    matmul_dtype: MXU operand dtype (default bf16: ~3-6x MXU throughput, half the
    operand HBM/VMEM bytes; accumulation/exp stay f32).  Pass jnp.float32 for strict
    parity with the PyTorch reference.
    """
    assert features0.shape == features1.shape, "both views must have matching shapes"
    B, T, D = features0.shape
    n_instances_per_image = T
    N = B * T                              # instances per view
    mm_itemsize = np.dtype(matmul_dtype).itemsize

    # --- static tiling: square, 128-aligned tiles (tm == tk == prep tile).
    tile = min(512, _round_up(max(N, 1), 128))
    Np = _round_up(N, tile)                # padded rows per view
    Mp = 2 * Np                            # padded rows of the concatenated matrix
    Dp = _round_up(max(D, 1), 128)         # padded feature lanes
    nblk = Np // tile

    # --- VMEM budget: 48 MiB fits v7x's 64 MiB/TC with headroom, well under v5e/v6e.
    vmem_limit = 48 * 1024 * 1024
    bt_bytes = Dp * Mp * mm_itemsize
    # Keep the RHS fully resident if even a (conservatively) double-buffered copy plus
    # ~12 MiB for blocks/exp-temporaries fits; otherwise stream (Dp, tile) columns.
    resident = (not _force_stream) and (2 * bt_bytes + (12 << 20) <= vmem_limit)

    # --- glue: reshape + zero-pad the small raw views (pad rows/lanes land as zeros,
    # which normalize to exactly-zero operand rows).  Everything downstream is fused.
    f0 = features0.reshape(N, D)
    f1 = features1.reshape(N, D)
    if (Np, Dp) != (N, D):
        f0 = jnp.pad(f0, ((0, Np - N), (0, Dp - D)))
        f1 = jnp.pad(f1, ((0, Np - N), (0, Dp - D)))

    inv_sqrt_temp = float(temp) ** -0.5
    a_full, bt_full, p_full = pl.pallas_call(
        functools.partial(_prep_kernel, inv_sqrt_temp=inv_sqrt_temp,
                          out_dtype=matmul_dtype),
        out_shape=(
            jax.ShapeDtypeStruct((Mp, Dp), matmul_dtype),   # [xn0; pad; xn1; pad]/sqrt(t)
            jax.ShapeDtypeStruct((Dp, Mp), matmul_dtype),   # its transpose
            jax.ShapeDtypeStruct((Mp, 1), jnp.float32),     # partner logit / temp
        ),
        grid_spec=pltpu.PrefetchScalarGridSpec(
            num_scalar_prefetch=0,
            grid=(2, nblk),
            in_specs=[pl.BlockSpec((tile, Dp), lambda v, i: (i, 0)),
                      pl.BlockSpec((tile, Dp), lambda v, i: (i, 0))],
            out_specs=[pl.BlockSpec((tile, Dp), lambda v, i: (v * nblk + i, 0)),
                       pl.BlockSpec((Dp, tile), lambda v, i: (0, v * nblk + i)),
                       pl.BlockSpec((tile, 1), lambda v, i: (v * nblk + i, 0))]),
        compiler_params=pltpu.CompilerParams(
            dimension_semantics=("parallel", "parallel"),
            vmem_limit_bytes=32 * 1024 * 1024),
    )(f0, f1)

    # --- main streaming similarity / exp / log-domain loss kernel.
    shift = 1.0 / float(temp)
    need_col_mask = Np != N
    jpad0 = nblk - 1                      # last column tile of the first half
    jpad1 = 2 * nblk - 1                  # last column tile of the second half
    n_valid_tail = N - (Np - tile)        # valid columns inside those tiles

    if resident:
        bt_spec = pl.BlockSpec((Dp, Mp), lambda i, j: (0, 0))      # fetched once
    else:
        bt_spec = pl.BlockSpec((Dp, tile), lambda i, j: (0, j))    # streamed

    losses = pl.pallas_call(
        functools.partial(_sim_loss_kernel, shift=shift, tile=tile,
                          resident=resident, need_col_mask=need_col_mask,
                          jpad0=jpad0, jpad1=jpad1, n_valid_tail=n_valid_tail),
        out_shape=jax.ShapeDtypeStruct((Mp, 1), jnp.float32),
        grid_spec=pltpu.PrefetchScalarGridSpec(
            num_scalar_prefetch=0,
            grid=(Mp // tile, Mp // tile),
            in_specs=[pl.BlockSpec((tile, Dp), lambda i, j: (i, 0)),
                      bt_spec,
                      pl.BlockSpec((tile, 1), lambda i, j: (i, 0))],
            out_specs=pl.BlockSpec((tile, 1), lambda i, j: (i, 0)),
            scratch_shapes=[pltpu.VMEM((tile, 1), jnp.float32)]),
        compiler_params=pltpu.CompilerParams(
            dimension_semantics=("parallel", "arbitrary"),
            vmem_limit_bytes=vmem_limit),
    )(a_full, bt_full, p_full)

    # Tiny final gather/reduce over the 2N real per-row losses stays in XLA so the
    # row-tile grid axis can remain "parallel" across TensorCores.
    per_row = jnp.concatenate([losses[:N, 0], losses[Np:Np + N, 0]], axis=0)
    if reduction == 'batchmean':
        return jnp.mean(per_row)
    elif reduction == 'sum':
        return jnp.sum(per_row)
    elif reduction == 'mean_instances_per_image':
        return jnp.sum(per_row) / jnp.float32(n_instances_per_image)
    else:
        # Matches PyTorch: unknown reduction returns the per-instance losses un-reduced.
        return per_row


def _reference(features0, features1, temp=0.1):
    """Pure-JAX reference mirroring the PyTorch code, for a sanity check."""
    B, T, D = features0.shape
    n_view = B * T
    inst = jnp.concatenate(
        [features0.reshape(-1, D), features1.reshape(-1, D)], axis=0
    ).astype(jnp.float32)
    xn = inst / jnp.maximum(jnp.linalg.norm(inst, axis=1, keepdims=True), 1e-12)
    e = jnp.exp(xn @ xn.T / temp)
    denom = e.sum(axis=1) - jnp.diag(e)
    idx = jnp.arange(e.shape[0])
    nom = e[idx, (idx + n_view) % e.shape[0]]
    return jnp.mean(-jnp.log(nom / denom))


if __name__ == "__main__":
    key = jax.random.PRNGKey(0)
    k0, k1 = jax.random.split(key)
    B, T, D = 2, 8, 32   # batch, instances per image, feature dim -> N = 16, 2N = 32
    features0 = jax.random.normal(k0, (B, T, D), dtype=jnp.float32)
    features1 = jax.random.normal(k1, (B, T, D), dtype=jnp.float32)

    ref = jax.block_until_ready(_reference(features0, features1, temp=0.1))

    # f32 MXU-operand path: strict parity with the PyTorch reference.
    loss_f32 = jax.block_until_ready(
        seqclr_loss(features0, features1, temp=0.1, reduction='batchmean',
                    matmul_dtype=jnp.float32))
    assert jnp.allclose(loss_f32, ref, rtol=2e-3, atol=2e-3), (loss_f32, ref)

    # Default bf16 MXU-operand path (f32 accumulation / exp), resident RHS.
    loss_bf16 = jax.block_until_ready(
        seqclr_loss(features0, features1, temp=0.1, reduction='batchmean'))
    assert jnp.allclose(loss_bf16, ref, rtol=3e-2, atol=3e-2), (loss_bf16, ref)

    # Streamed-RHS fallback path (exercised explicitly so both specs are validated).
    loss_stream = jax.block_until_ready(
        seqclr_loss(features0, features1, temp=0.1, reduction='batchmean',
                    _force_stream=True))
    assert jnp.allclose(loss_stream, ref, rtol=3e-2, atol=3e-2), (loss_stream, ref)

    print("KERNEL_OK")
</pallas_src>

<mosaic_0001>
module attributes {stable_mosaic.version = 11 : i64} {
  func.func @_prep_kernel(%arg0: i32, %arg1: i32, %arg2: memref<128x128xf32, #tpu.memory_space<vmem>>, %arg3: memref<128x128xf32, #tpu.memory_space<vmem>>, %arg4: memref<128x128xf32, #tpu.memory_space<vmem>>, %arg5: memref<128x128xf32, #tpu.memory_space<vmem>>, %arg6: memref<128x1xf32, #tpu.memory_space<vmem>>) attributes {dimension_semantics = [#tpu.dimension_semantics<parallel>, #tpu.dimension_semantics<parallel>], iteration_bounds = array<i64: 2, 1>, scalar_prefetch = 0 : i64, scratch_operands = 0 : i64, tpu.core_type = #tpu.core_type<tc>, window_params = [{transform_indices = @transform_0, window_bounds = array<i64: 128, 128>}, {transform_indices = @transform_1, window_bounds = array<i64: 128, 128>}, {transform_indices = @transform_2, window_bounds = array<i64: 128, 128>}, {transform_indices = @transform_3, window_bounds = array<i64: 128, 128>}, {transform_indices = @transform_4, window_bounds = array<i64: 128, 1>}]} {
    %c0 = arith.constant 0 : index
    %c0_0 = arith.constant 0 : index
    %0 = vector.load %arg2[%c0, %c0_0] : memref<128x128xf32, #tpu.memory_space<vmem>>, vector<128x128xf32>
    %c0_1 = arith.constant 0 : index
    %c0_2 = arith.constant 0 : index
    %1 = vector.load %arg3[%c0_1, %c0_2] : memref<128x128xf32, #tpu.memory_space<vmem>>, vector<128x128xf32>
    %2 = arith.mulf %0, %0 : vector<128x128xf32>
    %cst = arith.constant dense<0.000000e+00> : vector<128xf32>
    %3 = vector.multi_reduction <add>, %2, %cst [1] : vector<128x128xf32> to vector<128xf32>
    %4 = vector.shape_cast %3 : vector<128xf32> to vector<128x1xf32>
    %cst_3 = arith.constant 1.000000e-24 : f32
    %5 = vector.broadcast %cst_3 : f32 to vector<128x1xf32>
    %6 = arith.maximumf %4, %5 : vector<128x1xf32>
    %7 = math.rsqrt %6 : vector<128x1xf32>
    %8 = arith.mulf %1, %1 : vector<128x128xf32>
    %cst_4 = arith.constant dense<0.000000e+00> : vector<128xf32>
    %9 = vector.multi_reduction <add>, %8, %cst_4 [1] : vector<128x128xf32> to vector<128xf32>
    %10 = vector.shape_cast %9 : vector<128xf32> to vector<128x1xf32>
    %cst_5 = arith.constant 1.000000e-24 : f32
    %11 = vector.broadcast %cst_5 : f32 to vector<128x1xf32>
    %12 = arith.maximumf %10, %11 : vector<128x1xf32>
    %13 = math.rsqrt %12 : vector<128x1xf32>
    %cst_6 = arith.constant 3.1622777 : f32
    %14 = vector.broadcast %cst_6 : f32 to vector<128x1xf32>
    %15 = arith.mulf %7, %14 : vector<128x1xf32>
    %16 = vector.broadcast %15 : vector<128x1xf32> to vector<128x128xf32>
    %17 = arith.mulf %0, %16 : vector<128x128xf32>
    %cst_7 = arith.constant 3.1622777 : f32
    %18 = vector.broadcast %cst_7 : f32 to vector<128x1xf32>
    %19 = arith.mulf %13, %18 : vector<128x1xf32>
    %20 = vector.broadcast %19 : vector<128x1xf32> to vector<128x128xf32>
    %21 = arith.mulf %1, %20 : vector<128x128xf32>
    %22 = arith.mulf %17, %21 : vector<128x128xf32>
    %cst_8 = arith.constant dense<0.000000e+00> : vector<128xf32>
    %23 = vector.multi_reduction <add>, %22, %cst_8 [1] : vector<128x128xf32> to vector<128xf32>
    %24 = vector.shape_cast %23 : vector<128xf32> to vector<128x1xf32>
    %c0_9 = arith.constant 0 : index
    %c0_10 = arith.constant 0 : index
    %25 = vector.load %arg6[%c0_9, %c0_10] : memref<128x1xf32, #tpu.memory_space<vmem>>, vector<128x1xf32>
    tpu.vector_store %arg6[%c0_9, %c0_10], %24 {strides = array<i32>} : memref<128x1xf32, #tpu.memory_space<vmem>>, vector<128x1xf32>,
    %c0_i32 = arith.constant 0 : i32
    %26 = arith.cmpi eq, %arg0, %c0_i32 : i32
    %27 = arith.extui %26 : i1 to i32
    %c0_i32_11 = arith.constant 0 : i32
    %28 = arith.cmpi ne, %27, %c0_i32_11 : i32
    scf.if %28 {
      %c0_13 = arith.constant 0 : index
      %c0_14 = arith.constant 0 : index
      %32 = vector.load %arg4[%c0_13, %c0_14] : memref<128x128xf32, #tpu.memory_space<vmem>>, vector<128x128xf32>
      tpu.vector_store %arg4[%c0_13, %c0_14], %17 {strides = array<i32>} : memref<128x128xf32, #tpu.memory_space<vmem>>, vector<128x128xf32>,
      %33 = tpu.transpose %17, [1, 0] : vector<128x128xf32> -> vector<128x128xf32>
      %c0_15 = arith.constant 0 : index
      %c0_16 = arith.constant 0 : index
      %34 = vector.load %arg5[%c0_15, %c0_16] : memref<128x128xf32, #tpu.memory_space<vmem>>, vector<128x128xf32>
      tpu.vector_store %arg5[%c0_15, %c0_16], %33 {strides = array<i32>} : memref<128x128xf32, #tpu.memory_space<vmem>>, vector<128x128xf32>,
    } else {
    }
    %c1_i32 = arith.constant 1 : i32
    %29 = arith.cmpi eq, %arg0, %c1_i32 : i32
    %30 = arith.extui %29 : i1 to i32
    %c0_i32_12 = arith.constant 0 : i32
    %31 = arith.cmpi ne, %30, %c0_i32_12 : i32
    scf.if %31 {
      %c0_13 = arith.constant 0 : index
      %c0_14 = arith.constant 0 : index
      %32 = vector.load %arg4[%c0_13, %c0_14] : memref<128x128xf32, #tpu.memory_space<vmem>>, vector<128x128xf32>
      tpu.vector_store %arg4[%c0_13, %c0_14], %21 {strides = array<i32>} : memref<128x128xf32, #tpu.memory_space<vmem>>, vector<128x128xf32>,
      %33 = tpu.transpose %21, [1, 0] : vector<128x128xf32> -> vector<128x128xf32>
      %c0_15 = arith.constant 0 : index
      %c0_16 = arith.constant 0 : index
      %34 = vector.load %arg5[%c0_15, %c0_16] : memref<128x128xf32, #tpu.memory_space<vmem>>, vector<128x128xf32>
      tpu.vector_store %arg5[%c0_15, %c0_16], %33 {strides = array<i32>} : memref<128x128xf32, #tpu.memory_space<vmem>>, vector<128x128xf32>,
    } else {
    }
    return
  }
  func.func @transform_0(%arg0: i32, %arg1: i32) -> (i32, i32) {
    %c0_i32 = arith.constant 0 : i32
    %c0_i32_0 = arith.constant 0 : i32
    return %arg1, %c0_i32 : i32, i32
  }
  func.func @transform_1(%arg0: i32, %arg1: i32) -> (i32, i32) {
    %c0_i32 = arith.constant 0 : i32
    %c0_i32_0 = arith.constant 0 : i32
    return %arg1, %c0_i32 : i32, i32
  }
  func.func @transform_2(%arg0: i32, %arg1: i32) -> (i32, i32) {
    %c1_i32 = arith.constant 1 : i32
    %0 = arith.muli %arg0, %c1_i32 : i32
    %1 = arith.addi %0, %arg1 : i32
    %c0_i32 = arith.constant 0 : i32
    %c0_i32_0 = arith.constant 0 : i32
    return %1, %c0_i32 : i32, i32
  }
  func.func @transform_3(%arg0: i32, %arg1: i32) -> (i32, i32) {
    %c1_i32 = arith.constant 1 : i32
    %0 = arith.muli %arg0, %c1_i32 : i32
    %1 = arith.addi %0, %arg1 : i32
    %c0_i32 = arith.constant 0 : i32
    %c0_i32_0 = arith.constant 0 : i32
    return %c0_i32, %1 : i32, i32
  }
  func.func @transform_4(%arg0: i32, %arg1: i32) -> (i32, i32) {
    %c1_i32 = arith.constant 1 : i32
    %0 = arith.muli %arg0, %c1_i32 : i32
    %1 = arith.addi %0, %arg1 : i32
    %c0_i32 = arith.constant 0 : i32
    %c0_i32_0 = arith.constant 0 : i32
    return %1, %c0_i32 : i32, i32
  }
}

</mosaic_0001>

<bundles_post_ra>
// kernel: tpu_custom_call.1
= control target key start
LH: loop header
LB: loop body
LE: loop exit
PB: predicated region body
PF: predicated region fallthrough
CT: control target
= control target key end

     0   :  { %10 = vsyncpa [#allocation3], 0  ;;  %s1976_s0 = inlined_call_operand.hbm [shape: f32[128,128], index: 0, kind: input, shape index: {}]   ;;  %s1977_s1 = inlined_call_operand.hbm [shape: f32[128,128], index: 1, kind: input, shape index: {}]   ;;  %s1978_s2 = inlined_call_operand.hbm [shape: f32[256,128], index: 2, kind: output, shape index: {0}]   ;;  %s1979_s3 = inlined_call_operand.hbm [shape: f32[128,256], index: 3, kind: output, shape index: {1}]   ;;  %s1980_s4 = inlined_call_operand.vmem [shape: f32[256,1], index: 4, kind: output, shape index: {2}]  }
   0x1   :  { %11 = vsyncpa [#allocation6], 0 }
   0x2   :  { %12 = vsyncpa [#allocation4], 0 }
   0x3   :  { %14 = vsyncpa [#allocation4 + $0x1], 0 }
   0x4   :  { %15 = vsyncpa [#allocation9], 0 }
   0x5   :  { %17 = vsyncpa [#allocation9 + $0x1], 0  ;;  %s1302_s15 = smov 0   ;;  %s1304_s16 = smov 0  }
   0x6   :  { %s1306_s17 = smov 0   ;;  %s1308_s18 = smov 0  }
   0x7   :  { %s1310_s19 = smov 0   ;;  %s1312_s20 = smov 0  }
   0x8 LB: > { %s920_s21 = sadd.s32 4294967295, %s1266_s20   ;;  %s921_s22 = sadd.s32 4294967294, %s1266_s20   ;;  %s1266_s20 = sphi %s1312_s20, %s23_s20   ;;  %s1262_s19 = sphi %s1310_s19, %s1998_s19   ;;  %s1258_s18 = sphi %s1308_s18, %s1997_s18   ;;  %s1254_s17 = sphi %s1306_s17, %s1996_s17   ;;  %s1250_s16 = sphi %s1304_s16, %s1995_s16   ;;  %s1246_s15 = sphi %s1302_s15, %s1994_s15  }
   0x9   : > { %s35_s23 = sadd.s32 1, %s1262_s19  ;;  %s96_s24 = sadd.s32 1, %s1254_s17 }
   0xa   : > { %p37_p0 = scmp.ge.s32.totalorder %s35_s23, 2  ;;  %p106_p1 = scmp.ne.s32.totalorder %s1254_s17, %s1250_s16 }
   0xb   : > { %p107_p2 = scmp.eq.s32.totalorder %s920_s21, 1  ;;  %p112_p3 = scmp.ne.s32.totalorder %s1250_s16, %s1246_s15 }
   0xc   : > { %s2000_s23 = smov (%p37_p0, %s35_s23), 0  ;;  %p113_p5 = scmp.eq.s32.totalorder %s921_s22, 1 }
   0xd   : > { %p1342_p4 = por %p107_p2, %p106_p1  ;;  %s93_s26 = ssub.s32 %s1262_s19, %s2000_s23 }
   0xe   : > { %p922_p6 = scmp.ge.s32.totalorder %s1266_s20, 1  ;;  %p94_p7 = scmp.eq.s32.totalorder %s93_s26, 0 }
   0xf   : > { %s1985_s25 = scalar_select %p1342_p4, 1, 0 }
  0x10   : > { %p1349_p8 = por %p113_p5, %p112_p3  ;;  %p176_p9 = scmp.lt.s32.totalorder %s1266_s20, 3 }
  0x11   : > { %s1355_s28 = scalar_select %p94_p7, %s1254_s17, %s96_s24  }
  0x12   : > { %s1986_s27 = scalar_select %p1349_p8, 1, 0 }
  0x13   : > { %p1357_p10 = pnand %p922_p6, %p176_p9  ;;  %p1361_p11 = scmp.eq.s32.totalorder %s920_s21, 0 }
  0x14   : > { %s1268_s5 = smov [#allocation2]   ;;  %s1269_s8 = smov [#allocation5]  }
  0x15   : > { %s1987_s29 = scalar_select %p1357_p10, 1, 0 }
  0x16   : > { %s1988_s30 = scalar_select %p1361_p11, 1, 0 }
  0x17   : > { %p954_p12 = pneg %p1357_p10  ;;  %s191_s6 = sshll.u32 %s1268_s5, 4  ;;  %s192_s6 = int_to_ptr.vmem [resolvable:$true] %s191_s6 }
  0x18   : > { %s207_s9 = sshll.u32 %s1269_s8, 4  ;;  %s1092_s12 = scalar_lea.hbm %s1976_s0, 2048  ;;  %s1373_s9 = int_to_ptr.vmem [resolvable:$true] %s207_s9 }
  0x19   : > { %p1369_p13 = pnand %p1361_p11, %p954_p12  ;;  %p1093_p0 = scmp.ne.s32.totalorder %s1976_s0, %s1092_s12 }
  0x1a   : > { %p1099_p5 = scmp.lt.u32.totalorder %s1092_s12, %s1976_s0 }
  0x1b   : > { %p1094_p1 = pneg %p1369_p13 }
  0x1d   : > { %p1095_p2 = pnand %p1094_p1, %p1093_p0 }
  0x1f   : > { %p1096_p3 = pneg %p1095_p2 }
  0x21   : > { %p1101_p6 = pnand %p1099_p5, %p1096_p3 }
  0x23   : > { %1104 = shalt.err (!%p1101_p6)
}
  0x24   : > { %s1105_s24 = scalar_lea.vmem %s192_s6, 2048  ;;  %p1113_p8 = scmp.lt.s32.totalorder %s192_s6, %s192_s6 }
  0x25   : > { %p1106_p7 = scmp.ne.s32.totalorder %s192_s6, %s1105_s24  ;;  %p1114_p4 = scmp.lt.s32.totalorder %s1105_s24, %s1105_s24 }
  0x27   : > { %p1108_p9 = pnand %p1106_p7, %p1094_p1  ;;  %p1115_p11 = por %p1114_p4, %p1113_p8 }
  0x29   : > { %p1109_p12 = pneg %p1108_p9 }
  0x2b   : > { %p1116_p10 = pnand %p1115_p11, %p1109_p12 }
  0x2d   : > { %1119 = shalt.err (!%p1116_p10)
}
  0x2e   : > { %s1270_s26 = smov 128   ;;  %s1271_s5 = smov 8  }
  0x2f   : > { %957 = dma.hbm_to_vmem [thread:$0]  (!%p1369_p13), %s1976_s0, 2048, %s192_s6, [#allocation3], %s1270_s26, %s1270_s26, %s1271_s5  }
  0x30   : > { %s1120_s13 = scalar_lea.hbm %s1977_s1, 2048 }
  0x31   : > { %p1121_p0 = scmp.ne.s32.totalorder %s1977_s1, %s1120_s13  ;;  %p1127_p10 = scmp.lt.u32.totalorder %s1120_s13, %s1977_s1 }
  0x33   : > { %p1123_p4 = pnand %p1121_p0, %p1094_p1 }
  0x35   : > { %p1124_p8 = pneg %p1123_p4 }
  0x37   : > { %p1129_p11 = pnand %p1127_p10, %p1124_p8 }
  0x39   : > { %1132 = shalt.err (!%p1129_p11)
}
  0x3a   : > { %s1133_s6 = scalar_lea.vmem %s1373_s9, 2048  ;;  %p1141_p6 = scmp.lt.s32.totalorder %s1373_s9, %s1373_s9 }
  0x3b   : > { %p1134_p2 = scmp.ne.s32.totalorder %s1373_s9, %s1133_s6  ;;  %p1142_p7 = scmp.lt.s32.totalorder %s1133_s6, %s1133_s6 }
  0x3d   : > { %p1136_p3 = pnand %p1134_p2, %p1094_p1  ;;  %p1143_p9 = por %p1142_p7, %p1141_p6 }
  0x3f   : > { %p1137_p5 = pneg %p1136_p3 }
  0x41   : > { %p1144_p12 = pnand %p1143_p9, %p1137_p5 }
  0x43   : > { %1147 = shalt.err (!%p1144_p12)
}
  0x44   : > { %960 = dma.hbm_to_vmem [thread:$0]  (!%p1369_p13), %s1977_s1, 2048, %s1373_s9, [#allocation6], %s1270_s26, %s1270_s26, %s1271_s5  }
  0x45   : > { %p1990_p0 = scmp.ne.s32.totalorder %s1987_s29, 0 }
  0x46   : > { %p1991_p4 = scmp.ne.s32.totalorder (!%p1990_p0), %s1988_s30, 0 }
  0x47   : > { %223 = sbr.rel (%p1990_p0) target bundleno = 783 (0x30f), region = 28 }
  0x4e   : > { %1229 = dma.done.wait (%p1991_p4), [#allocation3], 2048  }
  0x4f   : > { %1231 = vsyncadd (%p1991_p4), [#allocation3], 4294965248 }
  0x50   : > { %1233 = dma.done.wait (%p1991_p4), [#allocation6], 2048  }
  0x51   : > { %1235 = vsyncadd (%p1991_p4), [#allocation6], 4294965248  ;;  %v1432_v0 = vld [vmem:[#allocation2 + $0x10] sm:$0xff]  ;;  %v1434_v1 = vld [vmem:[#allocation2] sm:$0xff]  ;;  %s1704_s29 = sand.u32 1, %s1250_s16   ;;  %s930_s7 = sshll.u32 %s1258_s18, 4 }
  0x52   : > { %v1436_v2 = vld [vmem:[#allocation2 + $0x18] sm:$0xff]  ;;  %v306_v3 = vmul.f32 %v1432_v0, %v1432_v0  ;;  %v304_v4 = vmul.f32 %v1434_v1, %v1434_v1  ;;  %v1442_v5 = vld [vmem:[#allocation2 + $0x8] sm:$0xff]  ;;  %v1450_v9 = vld [vmem:[#allocation2 + $0x20] sm:$0xff]  ;;  %s928_s30 = sshll.u32 %s1704_s29, 7  ;;  %p266_p13 = scmp.lt.s32.totalorder %s930_s7, 31  ;;  %vm576_vm0 = vcmask 7168  }
  0x53   : > { %v307_v6 = vmul.f32 %v1436_v2, %v1436_v2  ;;  %v305_v7 = vmul.f32 %v1442_v5, %v1442_v5  ;;  %v1448_v8 = vld [vmem:[#allocation2 + $0x28] sm:$0xff]  ;;  %v308_v11 = vmul.f32 %v1450_v9, %v1450_v9  ;;  %v1456_v12 = vld [vmem:[#allocation2 + $0x38] sm:$0xff]  ;;  %v1458_v13 = vld [vmem:[#allocation2 + $0x30] sm:$0xff]  ;;  %s1747_s12 = scalar_lea.vmem [#allocation7], %s928_s30  ;;  %s1751_s13 = scalar_lea.vmem [#allocation8], %s928_s30 }
  0x54   : > { %324 = vadd.xlane.f32.xlu1 %v306_v3  ;;  %320 = vadd.xlane.f32.xlu0 %v304_v4  ;;  %v309_v10 = vmul.f32 %v1448_v8, %v1448_v8  ;;  %v311_v14 = vmul.f32 %v1456_v12, %v1456_v12  ;;  %v310_v15 = vmul.f32 %v1458_v13, %v1458_v13  ;;  %v1464_v16 = vld [vmem:[#allocation2 + $0x48] sm:$0xff]  ;;  %v1466_v17 = vld [vmem:[#allocation2 + $0x40] sm:$0xff]  ;;  %v1472_v20 = vld [vmem:[#allocation2 + $0x58] sm:$0xff]  ;;  %s2002_s7 = smov (!%p266_p13, %s930_s7), 31  ;;  %p932_p1 = scmp.ne.s32.totalorder %s1258_s18, 0 }
  0x55   : > { %v313_v18 = vmul.f32 %v1464_v16, %v1464_v16  ;;  %v312_v19 = vmul.f32 %v1466_v17, %v1466_v17  ;;  %v1474_v21 = vld [vmem:[#allocation2 + $0x50] sm:$0xff]  ;;  %v315_v22 = vmul.f32 %v1472_v20, %v1472_v20  ;;  %v1480_v24 = vld [vmem:[#allocation2 + $0x68] sm:$0xff]  ;;  %v1482_v25 = vld [vmem:[#allocation2 + $0x60] sm:$0xff]  ;;  %s931_s9 = sshll.u32 %s2002_s7, 3 }
  0x56   : > { %v314_v23 = vmul.f32 %v1474_v21, %v1474_v21  ;;  %v317_v26 = vmul.f32 %v1480_v24, %v1480_v24  ;;  %v316_v27 = vmul.f32 %v1482_v25, %v1482_v25  ;;  %v1488_v28 = vld [vmem:[#allocation2 + $0x78] sm:$0xff]  ;;  %v1490_v29 = vld [vmem:[#allocation2 + $0x70] sm:$0xff]  ;;  %v1496_v32 = vld [vmem:[#allocation5 + $0x8] sm:$0xff]  ;;  %s1711_s11 = scalar_lea.vmem %s1980_s4, %s931_s9 }
  0x57   : > { %v319_v30 = vmul.f32 %v1488_v28, %v1488_v28  ;;  %v318_v31 = vmul.f32 %v1490_v29, %v1490_v29  ;;  %v1498_v33 = vld [vmem:[#allocation5] sm:$0xff]  ;;  %v385_v34 = vmul.f32 %v1496_v32, %v1496_v32  ;;  %v1504_v36 = vld [vmem:[#allocation5 + $0x18] sm:$0xff]  ;;  %v1506_v37 = vld [vmem:[#allocation5 + $0x10] sm:$0xff] }
  0x58   : > { %326 = vadd.xlane.f32.xlu1 %v307_v6  ;;  %322 = vadd.xlane.f32.xlu0 %v305_v7  ;;  %v384_v35 = vmul.f32 %v1498_v33, %v1498_v33  ;;  %v387_v38 = vmul.f32 %v1504_v36, %v1504_v36  ;;  %v386_v39 = vmul.f32 %v1506_v37, %v1506_v37  ;;  %v1512_v40 = vld [vmem:[#allocation5 + $0x28] sm:$0xff]  ;;  %v1514_v41 = vld [vmem:[#allocation5 + $0x20] sm:$0xff]  ;;  %v1520_v44 = vld [vmem:[#allocation5 + $0x38] sm:$0xff] }
  0x59   : > { %v389_v42 = vmul.f32 %v1512_v40, %v1512_v40  ;;  %v388_v43 = vmul.f32 %v1514_v41, %v1514_v41  ;;  %v1522_v45 = vld [vmem:[#allocation5 + $0x30] sm:$0xff]  ;;  %v391_v46 = vmul.f32 %v1520_v44, %v1520_v44  ;;  %v1528_v48 = vld [vmem:[#allocation5 + $0x48] sm:$0xff]  ;;  %v1530_v49 = vld [vmem:[#allocation5 + $0x40] sm:$0xff] }
  0x5a   : > { %v390_v47 = vmul.f32 %v1522_v45, %v1522_v45  ;;  %v393_v50 = vmul.f32 %v1528_v48, %v1528_v48  ;;  %v392_v51 = vmul.f32 %v1530_v49, %v1530_v49  ;;  %v1536_v52 = vld [vmem:[#allocation5 + $0x58] sm:$0xff]  ;;  %v1538_v53 = vld [vmem:[#allocation5 + $0x50] sm:$0xff]  ;;  %v1544_v56 = vld [vmem:[#allocation5 + $0x68] sm:$0xff] }
  0x5b   : > { %v395_v54 = vmul.f32 %v1536_v52, %v1536_v52  ;;  %v394_v55 = vmul.f32 %v1538_v53, %v1538_v53  ;;  %v1546_v57 = vld [vmem:[#allocation5 + $0x60] sm:$0xff]  ;;  %v397_v58 = vmul.f32 %v1544_v56, %v1544_v56  ;;  %v1552_v60 = vld [vmem:[#allocation5 + $0x78] sm:$0xff]  ;;  %v1554_v61 = vld [vmem:[#allocation5 + $0x70] sm:$0xff] }
  0x5c   : > { %330 = vadd.xlane.f32.xlu1 %v309_v10  ;;  %328 = vadd.xlane.f32.xlu0 %v308_v11  ;;  %v396_v59 = vmul.f32 %v1546_v57, %v1546_v57  ;;  %v399_v62 = vmul.f32 %v1552_v60, %v1552_v60  ;;  %v398_v63 = vmul.f32 %v1554_v61, %v1554_v61 }
  0x60   : > { %334 = vadd.xlane.f32.xlu1 %v311_v14  ;;  %332 = vadd.xlane.f32.xlu0 %v310_v15 }
  0x64   : > { %338 = vadd.xlane.f32.xlu1 %v313_v18  ;;  %336 = vadd.xlane.f32.xlu0 %v312_v19 }
  0x68   : > { %342 = vadd.xlane.f32.xlu1 %v315_v22  ;;  %340 = vadd.xlane.f32.xlu0 %v314_v23 }
  0x6c   : > { %346 = vadd.xlane.f32.xlu1 %v317_v26  ;;  %344 = vadd.xlane.f32.xlu0 %v316_v27 }
  0x70   : > { %350 = vadd.xlane.f32.xlu1 %v319_v30  ;;  %348 = vadd.xlane.f32.xlu0 %v318_v31 }
  0x74   : > { %402 = vadd.xlane.f32.xlu1 %v385_v34  ;;  %400 = vadd.xlane.f32.xlu0 %v384_v35 }
  0x78   : > { %406 = vadd.xlane.f32.xlu1 %v387_v38  ;;  %404 = vadd.xlane.f32.xlu0 %v386_v39 }
  0x7c   : > { %410 = vadd.xlane.f32.xlu1 %v389_v42  ;;  %408 = vadd.xlane.f32.xlu0 %v388_v43 }
  0x80   : > { %414 = vadd.xlane.f32.xlu1 %v391_v46  ;;  %412 = vadd.xlane.f32.xlu0 %v390_v47 }
  0x84   : > { %418 = vadd.xlane.f32.xlu1 %v393_v50  ;;  %416 = vadd.xlane.f32.xlu0 %v392_v51 }
  0x88   : > { %422 = vadd.xlane.f32.xlu1 %v395_v54  ;;  %420 = vadd.xlane.f32.xlu0 %v394_v55 }
  0x8c   : > { %426 = vadd.xlane.f32.xlu1 %v397_v58  ;;  %424 = vadd.xlane.f32.xlu0 %v396_v59 }
  0x90   : > { %430 = vadd.xlane.f32.xlu1 %v399_v62  ;;  %428 = vadd.xlane.f32.xlu0 %v398_v63 }
  0xe1   : > { %v325_v3 = vpop.xlane.xlu1 %324  ;;  %v321_v4 = vpop.xlane.xlu0 %320 }
  0xe2   : > { %v354_v30 = vmax.f32 %v325_v3, 1e-24  ;;  %v352_v31 = vmax.f32 %v321_v4, 1e-24 }
  0xe4   : > { %1028 = vrsqrt.f32 %v354_v30 }
  0xe5   : > { %v327_v6 = vpop.xlane.xlu1 %326  ;;  %v323_v7 = vpop.xlane.xlu0 %322  ;;  %1030 = vrsqrt.f32 %v352_v31 }
  0xe6   : > { %v353_v34 = vmax.f32 %v323_v7, 1e-24  ;;  %v355_v39 = vmax.f32 %v327_v6, 1e-24 }
  0xe8   : > { %1032 = vrsqrt.f32 %v353_v34 }
  0xe9   : > { %v331_v10 = vpop.xlane.xlu1 %330  ;;  %v329_v11 = vpop.xlane.xlu0 %328  ;;  %1034 = vrsqrt.f32 %v355_v39 }
  0xea   : > { %v357_v42 = vmax.f32 %v331_v10, 1e-24  ;;  %v356_v47 = vmax.f32 %v329_v11, 1e-24 }
  0xec   : > { %1036 = vrsqrt.f32 %v357_v42 }
  0xed   : > { %v335_v14 = vpop.xlane.xlu1 %334  ;;  %v333_v15 = vpop.xlane.xlu0 %332 }
  0xee   : > { %v359_v54 = vmax.f32 %v335_v14, 1e-24  ;;  %v358_v59 = vmax.f32 %v333_v15, 1e-24  ;;  %v1029_v4 = vpop.eup %1028 }
  0xef   : > { %v1031_v6 = vpop.eup %1030  ;;  %v466_v34 = vmul.f32 3.1622777, %v1029_v4 }
  0xf0   : > { %v464_v15 = vmul.f32 3.1622777, %v1031_v6 }
  0xf1   : > { %v339_v18 = vpop.xlane.xlu1 %338  ;;  %v337_v19 = vpop.xlane.xlu0 %336 }
  0xf2   : > { %v361_v3 = vmax.f32 %v339_v18, 1e-24  ;;  %v1033_v11 = vpop.eup %1032  ;;  %v360_v30 = vmax.f32 %v337_v19, 1e-24  ;;  %v1576_v4 = vmul.f32 %v464_v15, %v1434_v1 }
  0xf3   : > { %v1035_v42 = vpop.eup %1034 }
  0xf4   : > { %597 = vst [vmem:[%s1747_s12] sm:$0xff] (!%p932_p1), %v1576_v4 }
  0xf5   : > { %v343_v22 = vpop.xlane.xlu1 %342  ;;  %v1560_v23 = vpop.xlane.xlu0 %340 }
  0xf6   : > { %v363_v39 = vmax.f32 %v343_v22, 1e-24  ;;  %v1573_v22 = vmul.f32 %v466_v34, %v1432_v0 }
  0xf8   : > { %599 = vst [vmem:[%s1747_s12 + $0x10] sm:$0xff] (!%p932_p1), %v1573_v22 }
  0xf9   : > { %v1562_v26 = vpop.xlane.xlu1 %346  ;;  %v1564_v27 = vpop.xlane.xlu0 %344 }
  0xfa   : > { %v364_v34 = vmax.f32 %v1564_v27, 1e-24 }
  0xfd   : > { %v1566_v35 = vpop.xlane.xlu1 %350  ;;  %v1568_v38 = vpop.xlane.xlu0 %348 }
 0x101   : > { %v403_v43 = vpop.xlane.xlu1 %402  ;;  %v401_v46 = vpop.xlane.xlu0 %400 }
 0x102   : > { %v433_v50 = vmax.f32 %v403_v43, 1e-24  ;;  %v432_v51 = vmax.f32 %v401_v46, 1e-24  ;;  %v1037_v43 = vpop.eup %1036  ;;  %v465_v46 = vmul.f32 3.1622777, %v1033_v11 }
 0x104   : > { %1038 = vrsqrt.f32 %v433_v50  ;;  %v1579_v11 = vmul.f32 %v465_v46, %v1442_v5 }
 0x105   : > { %1040 = vrsqrt.f32 %v432_v51  ;;  %v407_v55 = vpop.xlane.xlu1 %406  ;;  %v405_v58 = vpop.xlane.xlu0 %404  ;;  %v362_v51 = vmax.f32 %v1560_v23, 1e-24 }
 0x106   : > { %1042 = vrsqrt.f32 %v356_v47  ;;  %v435_v62 = vmax.f32 %v407_v55, 1e-24  ;;  %v434_v63 = vmax.f32 %v405_v58, 1e-24  ;;  %v365_v58 = vmax.f32 %v1562_v26, 1e-24 }
 0x107   : > { %1044 = vrsqrt.f32 %v359_v54  ;;  %598 = vst [vmem:[%s1747_s12 + $0x8] sm:$0xff] (!%p932_p1), %v1579_v11 }
 0x108   : > { %1046 = vrsqrt.f32 %v435_v62 }
 0x109   : > { %1048 = vrsqrt.f32 %v434_v63  ;;  %v411_v7 = vpop.xlane.xlu1 %410  ;;  %v409_v10 = vpop.xlane.xlu0 %408  ;;  %v467_v63 = vmul.f32 3.1622777, %v1035_v42 }
 0x10a   : > { %1050 = vrsqrt.f32 %v358_v59  ;;  %v437_v14 = vmax.f32 %v411_v7, 1e-24  ;;  %v436_v31 = vmax.f32 %v409_v10, 1e-24  ;;  %v469_v7 = vmul.f32 3.1622777, %v1037_v43 }
 0x10b   : > { %1052 = vrsqrt.f32 %v361_v3  ;;  %v1593_v43 = vmul.f32 %v467_v63, %v1436_v2 }
 0x10c   : > { %1054 = vrsqrt.f32 %v437_v14 }
 0x10d   : > { %1056 = vrsqrt.f32 %v436_v31  ;;  %v415_v18 = vpop.xlane.xlu1 %414  ;;  %v413_v47 = vpop.xlane.xlu0 %412  ;;  %600 = vst [vmem:[%s1747_s12 + $0x18] sm:$0xff] (!%p932_p1), %v1593_v43 }
 0x10e   : > { %v1039_v50 = vpop.eup %1038  ;;  %1058 = vrsqrt.f32 %v360_v30  ;;  %v439_v54 = vmax.f32 %v415_v18, 1e-24  ;;  %v438_v55 = vmax.f32 %v413_v47, 1e-24 }
 0x10f   : > { %v1041_v19 = vpop.eup %1040  ;;  %1060 = vrsqrt.f32 %v363_v39  ;;  %v497_v59 = vmul.f32 3.1622777, %v1039_v50  ;;  %v1599_v50 = vmul.f32 %v469_v7, %v1448_v8 }
 0x110   : > { %v1043_v62 = vpop.eup %1042  ;;  %v496_v3 = vmul.f32 3.1622777, %v1041_v19  ;;  %1062 = vrsqrt.f32 %v439_v54  ;;  %v367_v54 = vmax.f32 %v1566_v35, 1e-24 }
 0x111   : > { %v1045_v6 = vpop.eup %1044  ;;  %1064 = vrsqrt.f32 %v438_v55  ;;  %v419_v23 = vpop.xlane.xlu1 %418  ;;  %v1582_v26 = vmul.f32 %v497_v59, %v1496_v32  ;;  %v366_v59 = vmax.f32 %v1568_v38, 1e-24  ;;  %602 = vst [vmem:[%s1747_s12 + $0x28] sm:$0xff] (!%p932_p1), %v1599_v50 }
 0x112   : > { %v417_v10 = vpop.xlane.xlu0 %416  ;;  %v1047_v0 = vpop.eup %1046  ;;  %1066 = vrsqrt.f32 %v362_v51  ;;  %v441_v30 = vmax.f32 %v419_v23, 1e-24  ;;  %v1585_v31 = vmul.f32 %v496_v3, %v1498_v33  ;;  %v468_v33 = vmul.f32 3.1622777, %v1043_v62 }
 0x113   : > { %v440_v14 = vmax.f32 %v417_v10, 1e-24  ;;  %v1049_v1 = vpop.eup %1048  ;;  %1068 = vrsqrt.f32 %v365_v58  ;;  %v499_v39 = vmul.f32 3.1622777, %v1047_v0  ;;  %v529_v42 = vmul.f32 %v1582_v26, %v1579_v11 }
 0x114   : > { %v1051_v5 = vpop.eup %1050  ;;  %v498_v15 = vmul.f32 3.1622777, %v1049_v1  ;;  %1070 = vrsqrt.f32 %v441_v30  ;;  %v528_v32 = vmul.f32 %v1585_v31, %v1576_v4  ;;  %v471_v8 = vmul.f32 3.1622777, %v1045_v6 }
 0x115   : > { %v1053_v46 = vpop.eup %1052  ;;  %1072 = vrsqrt.f32 %v440_v14  ;;  %v423_v18 = vpop.xlane.xlu1 %422  ;;  %546 = vadd.xlane.f32.xlu1 %v529_v42  ;;  %v1596_v27 = vmul.f32 %v499_v39, %v1504_v36  ;;  %v470_v23 = vmul.f32 3.1622777, %v1051_v5  ;;  %v1614_v38 = vmul.f32 %v468_v33, %v1450_v9 }
 0x116   : > { %v421_v47 = vpop.xlane.xlu0 %420  ;;  %v1055_v51 = vpop.eup %1054  ;;  %v443_v55 = vmax.f32 %v423_v18, 1e-24  ;;  %544 = vadd.xlane.f32.xlu0 %v528_v32  ;;  %v1603_v2 = vmul.f32 %v498_v15, %v1506_v37  ;;  %1074 = vrsqrt.f32 %v364_v34  ;;  %v1624_v15 = vmul.f32 %v471_v8, %v1456_v12 }
 0x117   : > { %v442_v19 = vmax.f32 %v421_v47, 1e-24  ;;  %v1057_v58 = vpop.eup %1056  ;;  %v501_v62 = vmul.f32 3.1622777, %v1055_v51  ;;  %v531_v36 = vmul.f32 %v1596_v27, %v1593_v43  ;;  %v473_v33 = vmul.f32 3.1622777, %v1053_v46 }
 0x118   : > { %v1059_v63 = vpop.eup %1058  ;;  %v500_v3 = vmul.f32 3.1622777, %v1057_v58  ;;  %1076 = vrsqrt.f32 %v443_v55  ;;  %v530_v35 = vmul.f32 %v1603_v2, %v1573_v22  ;;  %v1630_v51 = vmul.f32 %v470_v23, %v1458_v13  ;;  %601 = vst [vmem:[%s1747_s12 + $0x20] sm:$0xff] (!%p932_p1), %v1614_v38  ;;  %604 = vst [vmem:[%s1747_s12 + $0x38] sm:$0xff] (!%p932_p1), %v1624_v15 }
 0x119   : > { %v1061_v7 = vpop.eup %1060  ;;  %1078 = vrsqrt.f32 %v442_v19  ;;  %v427_v37 = vpop.xlane.xlu1 %426  ;;  %550 = vadd.xlane.f32.xlu1 %v531_v36  ;;  %v1611_v0 = vmul.f32 %v501_v62, %v1512_v40  ;;  %v472_v55 = vmul.f32 3.1622777, %v1059_v63  ;;  %v1640_v63 = vmul.f32 %v473_v33, %v1464_v16 }
 0x11a   : > { %v425_v10 = vpop.xlane.xlu0 %424  ;;  %v1063_v30 = vpop.eup %1062  ;;  %1080 = vrsqrt.f32 %v367_v54  ;;  %v445_v6 = vmax.f32 %v427_v37, 1e-24  ;;  %548 = vadd.xlane.f32.xlu0 %v530_v35  ;;  %v1617_v1 = vmul.f32 %v500_v3, %v1514_v41  ;;  %v475_v8 = vmul.f32 3.1622777, %v1061_v7  ;;  %603 = vst [vmem:[%s1747_s12 + $0x30] sm:$0xff] (!%p932_p1), %v1630_v51 }
 0x11b   : > { %v444_v14 = vmax.f32 %v425_v10, 1e-24  ;;  %v1065_v34 = vpop.eup %1064  ;;  %1082 = vrsqrt.f32 %v366_v59  ;;  %v503_v39 = vmul.f32 3.1622777, %v1063_v30  ;;  %v533_v42 = vmul.f32 %v1611_v0, %v1599_v50  ;;  %606 = vst [vmem:[%s1747_s12 + $0x48] sm:$0xff] (!%p932_p1), %v1640_v63 }
 0x11c   : > { %v1067_v5 = vpop.eup %1066  ;;  %v502_v40 = vmul.f32 3.1622777, %v1065_v34  ;;  %1084 = vrsqrt.f32 %v445_v6  ;;  %v532_v9 = vmul.f32 %v1617_v1, %v1614_v38  ;;  %v1646_v23 = vmul.f32 %v472_v55, %v1466_v17 }
 0x11d   : > { %v1069_v32 = vpop.eup %1068  ;;  %1086 = vrsqrt.f32 %v444_v14  ;;  %v431_v41 = vpop.xlane.xlu1 %430  ;;  %554 = vadd.xlane.f32.xlu1 %v533_v42  ;;  %v1627_v47 = vmul.f32 %v503_v39, %v1520_v44  ;;  %v474_v35 = vmul.f32 3.1622777, %v1067_v5  ;;  %v1656_v39 = vmul.f32 %v475_v8, %v1472_v20 }
 0x11e   : > { %v429_v18 = vpop.xlane.xlu0 %428  ;;  %v1071_v54 = vpop.eup %1070  ;;  %v447_v19 = vmax.f32 %v431_v41, 1e-24  ;;  %552 = vadd.xlane.f32.xlu0 %v532_v9  ;;  %v1633_v12 = vmul.f32 %v502_v40, %v1522_v45  ;;  %v477_v34 = vmul.f32 3.1622777, %v1069_v32  ;;  %605 = vst [vmem:[%s1747_s12 + $0x40] sm:$0xff] (!%p932_p1), %v1646_v23 }
 0x11f   : > { %v446_v58 = vmax.f32 %v429_v18, 1e-24  ;;  %v1073_v59 = vpop.eup %1072  ;;  %v505_v46 = vmul.f32 3.1622777, %v1071_v54  ;;  %v535_v62 = vmul.f32 %v1627_v47, %v1624_v15  ;;  %v1662_v5 = vmul.f32 %v474_v35, %v1474_v21  ;;  %608 = vst [vmem:[%s1747_s12 + $0x58] sm:$0xff] (!%p932_p1), %v1656_v39 }
 0x120   : > { %v504_v36 = vmul.f32 3.1622777, %v1073_v59  ;;  %1088 = vrsqrt.f32 %v447_v19  ;;  %v534_v44 = vmul.f32 %v1633_v12, %v1630_v51  ;;  %v1075_v13 = vpop.eup %1074  ;;  %v1672_v18 = vmul.f32 %v477_v34, %v1480_v24 }
 0x121   : > { %1090 = vrsqrt.f32 %v446_v58  ;;  %558 = vadd.xlane.f32.xlu1 %v535_v62  ;;  %v1643_v45 = vmul.f32 %v505_v46, %v1528_v48  ;;  %v476_v42 = vmul.f32 3.1622777, %v1075_v13  ;;  %607 = vst [vmem:[%s1747_s12 + $0x50] sm:$0xff] (!%p932_p1), %v1662_v5 }
 0x122   : > { %v1077_v3 = vpop.eup %1076  ;;  %556 = vadd.xlane.f32.xlu0 %v534_v44  ;;  %v1649_v37 = vmul.f32 %v504_v36, %v1530_v49  ;;  %610 = vst [vmem:[%s1747_s12 + $0x68] sm:$0xff] (!%p932_p1), %v1672_v18 }
 0x123   : > { %v1079_v10 = vpop.eup %1078  ;;  %v507_v30 = vmul.f32 3.1622777, %v1077_v3  ;;  %v537_v7 = vmul.f32 %v1643_v45, %v1640_v63  ;;  %v1678_v55 = vmul.f32 %v476_v42, %v1482_v25 }
 0x124   : > { %v1081_v6 = vpop.eup %1080  ;;  %v506_v16 = vmul.f32 3.1622777, %v1079_v10  ;;  %v536_v48 = vmul.f32 %v1649_v37, %v1646_v23 }
 0x125   : > { %v1083_v14 = vpop.eup %1082  ;;  %562 = vadd.xlane.f32.xlu1 %v537_v7  ;;  %v1659_v17 = vmul.f32 %v507_v30, %v1536_v52  ;;  %v479_v52 = vmul.f32 3.1622777, %v1081_v6  ;;  %609 = vst [vmem:[%s1747_s12 + $0x60] sm:$0xff] (!%p932_p1), %v1678_v55 }
 0x126   : > { %v1085_v49 = vpop.eup %1084  ;;  %560 = vadd.xlane.f32.xlu0 %v536_v48  ;;  %v1665_v40 = vmul.f32 %v506_v16, %v1538_v53  ;;  %v478_v53 = vmul.f32 3.1622777, %v1083_v14 }
 0x127   : > { %v1087_v9 = vpop.eup %1086  ;;  %v509_v33 = vmul.f32 3.1622777, %v1085_v49  ;;  %v539_v32 = vmul.f32 %v1659_v17, %v1656_v39  ;;  %v1688_v62 = vmul.f32 %v479_v52, %v1488_v28 }
 0x128   : > { %v508_v41 = vmul.f32 3.1622777, %v1087_v9  ;;  %v538_v20 = vmul.f32 %v1665_v40, %v1662_v5 }
 0x129   : > { %566 = vadd.xlane.f32.xlu1 %v539_v32  ;;  %v1675_v21 = vmul.f32 %v509_v33, %v1544_v56  ;;  %612 = vst [vmem:[%s1747_s12 + $0x78] sm:$0xff] (!%p932_p1), %v1688_v62 }
 0x12a   : > { %v1089_v54 = vpop.eup %1088  ;;  %564 = vadd.xlane.f32.xlu0 %v538_v20  ;;  %v1681_v19 = vmul.f32 %v508_v41, %v1546_v57  ;;  %v1694_v57 = vmul.f32 %v478_v53, %v1490_v29 }
 0x12b   : > { %v1091_v58 = vpop.eup %1090  ;;  %v511_v59 = vmul.f32 3.1622777, %v1089_v54  ;;  %v541_v24 = vmul.f32 %v1675_v21, %v1672_v18 }
 0x12c   : > { %v510_v46 = vmul.f32 3.1622777, %v1091_v58  ;;  %v540_v56 = vmul.f32 %v1681_v19, %v1678_v55  ;;  %611 = vst [vmem:[%s1747_s12 + $0x70] sm:$0xff] (!%p932_p1), %v1694_v57 }
 0x12d   : > { %570 = vadd.xlane.f32.xlu1 %v541_v24  ;;  %v1691_v25 = vmul.f32 %v511_v59, %v1552_v60 }
 0x12e   : > { %568 = vadd.xlane.f32.xlu0 %v540_v56  ;;  %v1697_v36 = vmul.f32 %v510_v46, %v1554_v61 }
 0x12f   : > { %v543_v44 = vmul.f32 %v1691_v25, %v1688_v62 }
 0x130   : > { %v542_v13 = vmul.f32 %v1697_v36, %v1694_v57 }
 0x131   : > { %574 = vadd.xlane.f32.xlu1 %v543_v44 }
 0x132   : > { %572 = vadd.xlane.f32.xlu0 %v542_v13 }
 0x15f   : > { %613 = vxpose.xlu0.b32.start [1/16] (!%p932_p1), %v1576_v4, 128 }
 0x163   : > { %614 = vxpose.xlu0.b32.cont [2/16] (!%p932_p1), %v1579_v11, 128 }
 0x167   : > { %615 = vxpose.xlu0.b32.cont [3/16] (!%p932_p1), %v1573_v22, 128 }
 0x16b   : > { %616 = vxpose.xlu0.b32.cont [4/16] (!%p932_p1), %v1593_v43, 128 }
 0x16f   : > { %617 = vxpose.xlu0.b32.cont [5/16] (!%p932_p1), %v1614_v38, 128 }
 0x173   : > { %618 = vxpose.xlu0.b32.cont [6/16] (!%p932_p1), %v1599_v50, 128 }
 0x177   : > { %619 = vxpose.xlu0.b32.cont [7/16] (!%p932_p1), %v1630_v51, 128 }
 0x17b   : > { %620 = vxpose.xlu0.b32.cont [8/16] (!%p932_p1), %v1624_v15, 128 }
 0x17f   : > { %621 = vxpose.xlu0.b32.cont [9/16] (!%p932_p1), %v1646_v23, 128 }
 0x183   : > { %622 = vxpose.xlu0.b32.cont [10/16] (!%p932_p1), %v1640_v63, 128 }
 0x187   : > { %623 = vxpose.xlu0.b32.cont [11/16] (!%p932_p1), %v1662_v5, 128 }
 0x18b   : > { %624 = vxpose.xlu0.b32.cont [12/16] (!%p932_p1), %v1656_v39, 128 }
 0x18f   : > { %625 = vxpose.xlu0.b32.cont [13/16] (!%p932_p1), %v1678_v55, 128 }
 0x193   : > { %626 = vxpose.xlu0.b32.cont [14/16] (!%p932_p1), %v1672_v18, 128 }
 0x197   : > { %627 = vxpose.xlu0.b32.cont [15/16] (!%p932_p1), %v1694_v57, 128 }
 0x19b   : > { %628 = vxpose.xlu0.b32.end [16/16] (!%p932_p1), %v1688_v62, 128 }
 0x1a2   : > { %v547_v28 = vpop.xlane.xlu1 %546 }
 0x1a3   : > { %578 = vst.msk [vmem:[%s1711_s11 + $0x8] sm:$0xff] %vm576_vm0, %v547_v28  ;;  %v545_v29 = vpop.xlane.xlu0 %544 }
 0x1a4   : > { %577 = vst.msk [vmem:[%s1711_s11] sm:$0xff] %vm576_vm0, %v545_v29 }
 0x1a6   : > { %v551_v60 = vpop.xlane.xlu1 %550 }
 0x1a7   : > { %580 = vst.msk [vmem:[%s1711_s11 + $0x18] sm:$0xff] %vm576_vm0, %v551_v60  ;;  %v549_v61 = vpop.xlane.xlu0 %548 }
 0x1a8   : > { %579 = vst.msk [vmem:[%s1711_s11 + $0x10] sm:$0xff] %vm576_vm0, %v549_v61 }
 0x1aa   : > { %v555_v8 = vpop.xlane.xlu1 %554 }
 0x1ab   : > { %582 = vst.msk [vmem:[%s1711_s11 + $0x28] sm:$0xff] %vm576_vm0, %v555_v8  ;;  %v553_v3 = vpop.xlane.xlu0 %552 }
 0x1ac   : > { %581 = vst.msk [vmem:[%s1711_s11 + $0x20] sm:$0xff] %vm576_vm0, %v553_v3 }
 0x1ae   : > { %v559_v35 = vpop.xlane.xlu1 %558 }
 0x1af   : > { %584 = vst.msk [vmem:[%s1711_s11 + $0x38] sm:$0xff] %vm576_vm0, %v559_v35  ;;  %v557_v10 = vpop.xlane.xlu0 %556 }
 0x1b0   : > { %583 = vst.msk [vmem:[%s1711_s11 + $0x30] sm:$0xff] %vm576_vm0, %v557_v10 }
 0x1b2   : > { %v563_v30 = vpop.xlane.xlu1 %562 }
 0x1b3   : > { %586 = vst.msk [vmem:[%s1711_s11 + $0x48] sm:$0xff] %vm576_vm0, %v563_v30  ;;  %v561_v7 = vpop.xlane.xlu0 %560 }
 0x1b4   : > { %585 = vst.msk [vmem:[%s1711_s11 + $0x40] sm:$0xff] %vm576_vm0, %v561_v7 }
 0x1b6   : > { %v567_v6 = vpop.xlane.xlu1 %566 }
 0x1b7   : > { %588 = vst.msk [vmem:[%s1711_s11 + $0x58] sm:$0xff] %vm576_vm0, %v567_v6  ;;  %v565_v16 = vpop.xlane.xlu0 %564 }
 0x1b8   : > { %587 = vst.msk [vmem:[%s1711_s11 + $0x50] sm:$0xff] %vm576_vm0, %v565_v16 }
 0x1ba   : > { %v571_v48 = vpop.xlane.xlu1 %570  ;;  %596 = sbr.rel (%p932_p1) target bundleno = 541 (0x21d), region = 40 }
 0x1bb   : > { %590 = vst.msk [vmem:[%s1711_s11 + $0x68] sm:$0xff] %vm576_vm0, %v571_v48  ;;  %v569_v14 = vpop.xlane.xlu0 %568 }
 0x1bc   : > { %589 = vst.msk [vmem:[%s1711_s11 + $0x60] sm:$0xff] %vm576_vm0, %v569_v14 }
 0x1be   : > { %v575_v34 = vpop.xlane.xlu1 %574 }
 0x1bf   : > { %592 = vst.msk [vmem:[%s1711_s11 + $0x78] sm:$0xff] %vm576_vm0, %v575_v34  ;;  %v573_v49 = vpop.xlane.xlu0 %572 }
 0x1c0   : > { %591 = vst.msk [vmem:[%s1711_s11 + $0x70] sm:$0xff] %vm576_vm0, %v573_v49 }
 0x1df   : > { %v629_v22 = vpop.trf.xlu0 }
 0x1e0   : > { %645 = vst [vmem:[%s1751_s13] sm:$0xff] %v629_v22 }
 0x1e3   : > { %v630_v4 = vpop.trf.xlu0 }
 0x1e4   : > { %646 = vst [vmem:[%s1751_s13 + $0x8] sm:$0xff] %v630_v4 }
 0x1e7   : > { %v631_v11 = vpop.trf.xlu0 }
 0x1e8   : > { %647 = vst [vmem:[%s1751_s13 + $0x10] sm:$0xff] %v631_v11 }
 0x1eb   : > { %v632_v43 = vpop.trf.xlu0 }
 0x1ec   : > { %648 = vst [vmem:[%s1751_s13 + $0x18] sm:$0xff] %v632_v43 }
 0x1ef   : > { %v633_v50 = vpop.trf.xlu0 }
 0x1f0   : > { %649 = vst [vmem:[%s1751_s13 + $0x20] sm:$0xff] %v633_v50 }
 0x1f3   : > { %v634_v38 = vpop.trf.xlu0 }
 0x1f4   : > { %650 = vst [vmem:[%s1751_s13 + $0x28] sm:$0xff] %v634_v38 }
 0x1f7   : > { %v635_v15 = vpop.trf.xlu0 }
 0x1f8   : > { %651 = vst [vmem:[%s1751_s13 + $0x30] sm:$0xff] %v635_v15 }
 0x1fb   : > { %v636_v51 = vpop.trf.xlu0 }
 0x1fc   : > { %652 = vst [vmem:[%s1751_s13 + $0x38] sm:$0xff] %v636_v51 }
 0x1ff   : > { %v637_v63 = vpop.trf.xlu0 }
 0x200   : > { %653 = vst [vmem:[%s1751_s13 + $0x40] sm:$0xff] %v637_v63 }
 0x203   : > { %v638_v23 = vpop.trf.xlu0 }
 0x204   : > { %654 = vst [vmem:[%s1751_s13 + $0x48] sm:$0xff] %v638_v23 }
 0x207   : > { %v639_v39 = vpop.trf.xlu0 }
 0x208   : > { %655 = vst [vmem:[%s1751_s13 + $0x50] sm:$0xff] %v639_v39 }
 0x20b   : > { %v640_v42 = vpop.trf.xlu0 }
 0x20c   : > { %656 = vst [vmem:[%s1751_s13 + $0x58] sm:$0xff] %v640_v42 }
 0x20f   : > { %v641_v5 = vpop.trf.xlu0 }
 0x210   : > { %657 = vst [vmem:[%s1751_s13 + $0x60] sm:$0xff] %v641_v5 }
 0x213   : > { %v642_v9 = vpop.trf.xlu0 }
 0x214   : > { %658 = vst [vmem:[%s1751_s13 + $0x68] sm:$0xff] %v642_v9 }
 0x217   : > { %v643_v33 = vpop.trf.xlu0 }
 0x218   : > { %659 = vst [vmem:[%s1751_s13 + $0x70] sm:$0xff] %v643_v33 }
 0x21b   : > { %v644_v32 = vpop.trf.xlu0 }
 0x21c   : > { %660 = vst [vmem:[%s1751_s13 + $0x78] sm:$0xff] %v644_v32 }
 0x21d PF: > { %p933_p8 = scmp.ne.s32.totalorder %s1258_s18, 1 }
 0x21e   : > { %665 = vst [vmem:[%s1747_s12] sm:$0xff] (!%p933_p8), %v1585_v31  ;;  %666 = vst [vmem:[%s1747_s12 + $0x8] sm:$0xff] (!%p933_p8), %v1582_v26  ;;  %681 = vxpose.xlu0.b32.start [1/16] (!%p933_p8), %v1585_v31, 128 }
 0x21f   : > { %664 = sbr.rel (%p933_p8) target bundleno = 732 (0x2dc), region = 44  ;;  %667 = vst [vmem:[%s1747_s12 + $0x10] sm:$0xff] (!%p933_p8), %v1603_v2  ;;  %668 = vst [vmem:[%s1747_s12 + $0x18] sm:$0xff] (!%p933_p8), %v1596_v27 }
 0x220   : > { %669 = vst [vmem:[%s1747_s12 + $0x20] sm:$0xff] (!%p933_p8), %v1617_v1  ;;  %670 = vst [vmem:[%s1747_s12 + $0x28] sm:$0xff] (!%p933_p8), %v1611_v0 }
 0x221   : > { %671 = vst [vmem:[%s1747_s12 + $0x30] sm:$0xff] (!%p933_p8), %v1633_v12  ;;  %672 = vst [vmem:[%s1747_s12 + $0x38] sm:$0xff] (!%p933_p8), %v1627_v47 }
 0x222   : > { %673 = vst [vmem:[%s1747_s12 + $0x40] sm:$0xff] (!%p933_p8), %v1649_v37  ;;  %674 = vst [vmem:[%s1747_s12 + $0x48] sm:$0xff] (!%p933_p8), %v1643_v45  ;;  %682 = vxpose.xlu0.b32.cont [2/16] (!%p933_p8), %v1582_v26, 128 }
 0x223   : > { %675 = vst [vmem:[%s1747_s12 + $0x50] sm:$0xff] (!%p933_p8), %v1665_v40  ;;  %676 = vst [vmem:[%s1747_s12 + $0x58] sm:$0xff] (!%p933_p8), %v1659_v17 }
 0x224   : > { %677 = vst [vmem:[%s1747_s12 + $0x60] sm:$0xff] (!%p933_p8), %v1681_v19  ;;  %678 = vst [vmem:[%s1747_s12 + $0x68] sm:$0xff] (!%p933_p8), %v1675_v21 }
 0x225   : > { %679 = vst [vmem:[%s1747_s12 + $0x70] sm:$0xff] (!%p933_p8), %v1697_v36  ;;  %680 = vst [vmem:[%s1747_s12 + $0x78] sm:$0xff] (!%p933_p8), %v1691_v25 }
 0x226   : > { %683 = vxpose.xlu0.b32.cont [3/16] %v1603_v2, 128 }
 0x22a   : > { %684 = vxpose.xlu0.b32.cont [4/16] %v1596_v27, 128 }
 0x22e   : > { %685 = vxpose.xlu0.b32.cont [5/16] %v1617_v1, 128 }
 0x232   : > { %686 = vxpose.xlu0.b32.cont [6/16] %v1611_v0, 128 }
 0x236   : > { %687 = vxpose.xlu0.b32.cont [7/16] %v1633_v12, 128 }
 0x23a   : > { %688 = vxpose.xlu0.b32.cont [8/16] %v1627_v47, 128 }
 0x23e   : > { %689 = vxpose.xlu0.b32.cont [9/16] %v1649_v37, 128 }
 0x242   : > { %690 = vxpose.xlu0.b32.cont [10/16] %v1643_v45, 128 }
 0x246   : > { %691 = vxpose.xlu0.b32.cont [11/16] %v1665_v40, 128 }
 0x24a   : > { %692 = vxpose.xlu0.b32.cont [12/16] %v1659_v17, 128 }
 0x24e   : > { %693 = vxpose.xlu0.b32.cont [13/16] %v1681_v19, 128 }
 0x252   : > { %694 = vxpose.xlu0.b32.cont [14/16] %v1675_v21, 128 }
 0x256   : > { %695 = vxpose.xlu0.b32.cont [15/16] %v1697_v36, 128 }
 0x25a   : > { %696 = vxpose.xlu0.b32.end [16/16] %v1691_v25, 128 }
 0x29e   : > { %v697_v26 = vpop.trf.xlu0 }
 0x29f   : > { %713 = vst [vmem:[%s1751_s13] sm:$0xff] %v697_v26 }
 0x2a2   : > { %v698_v31 = vpop.trf.xlu0 }
 0x2a3   : > { %714 = vst [vmem:[%s1751_s13 + $0x8] sm:$0xff] %v698_v31 }
 0x2a6   : > { %v699_v27 = vpop.trf.xlu0 }
 0x2a7   : > { %715 = vst [vmem:[%s1751_s13 + $0x10] sm:$0xff] %v699_v27 }
 0x2aa   : > { %v700_v2 = vpop.trf.xlu0 }
 0x2ab   : > { %716 = vst [vmem:[%s1751_s13 + $0x18] sm:$0xff] %v700_v2 }
 0x2ae   : > { %v701_v0 = vpop.trf.xlu0 }
 0x2af   : > { %717 = vst [vmem:[%s1751_s13 + $0x20] sm:$0xff] %v701_v0 }
 0x2b2   : > { %v702_v1 = vpop.trf.xlu0 }
 0x2b3   : > { %718 = vst [vmem:[%s1751_s13 + $0x28] sm:$0xff] %v702_v1 }
 0x2b6   : > { %v703_v47 = vpop.trf.xlu0 }
 0x2b7   : > { %719 = vst [vmem:[%s1751_s13 + $0x30] sm:$0xff] %v703_v47 }
 0x2ba   : > { %v704_v12 = vpop.trf.xlu0 }
 0x2bb   : > { %720 = vst [vmem:[%s1751_s13 + $0x38] sm:$0xff] %v704_v12 }
 0x2be   : > { %v705_v45 = vpop.trf.xlu0 }
 0x2bf   : > { %721 = vst [vmem:[%s1751_s13 + $0x40] sm:$0xff] %v705_v45 }
 0x2c2   : > { %v706_v37 = vpop.trf.xlu0 }
 0x2c3   : > { %722 = vst [vmem:[%s1751_s13 + $0x48] sm:$0xff] %v706_v37 }
 0x2c6   : > { %v707_v17 = vpop.trf.xlu0 }
 0x2c7   : > { %723 = vst [vmem:[%s1751_s13 + $0x50] sm:$0xff] %v707_v17 }
 0x2ca   : > { %v708_v40 = vpop.trf.xlu0 }
 0x2cb   : > { %724 = vst [vmem:[%s1751_s13 + $0x58] sm:$0xff] %v708_v40 }
 0x2ce   : > { %v709_v41 = vpop.trf.xlu0 }
 0x2cf   : > { %725 = vst [vmem:[%s1751_s13 + $0x60] sm:$0xff] %v709_v41 }
 0x2d2   : > { %v710_v20 = vpop.trf.xlu0 }
 0x2d3   : > { %726 = vst [vmem:[%s1751_s13 + $0x68] sm:$0xff] %v710_v20 }
 0x2d6   : > { %v711_v52 = vpop.trf.xlu0 }
 0x2d7   : > { %727 = vst [vmem:[%s1751_s13 + $0x70] sm:$0xff] %v711_v52 }
 0x2da   : > { %v712_v18 = vpop.trf.xlu0 }
 0x2db   : > { %728 = vst [vmem:[%s1751_s13 + $0x78] sm:$0xff] %v712_v18 }
 0x2dc PF: > { %s941_s14 = sshll.u32 %s1258_s18, 11  ;;  %s755_s6 = sshll.u32 %s1747_s12, 4  ;;  %s1890_s6 = int_to_ptr.vmem [resolvable:$true] %s755_s6 }
 0x2dd   : > { %s1887_s24 = scalar_lea.hbm %s1978_s2, %s941_s14  ;;  %s730_s8 = scalar_lea.sflag [#allocation4], %s1704_s29 }
 0x2de   : > { %s1148_s10 = scalar_lea.vmem %s1890_s6, 2048  ;;  %p1992_p11 = scmp.ne.s32.totalorder %s1985_s25, 0 }
 0x2df   : > { %p1149_p10 = scmp.ne.s32.totalorder %s1890_s6, %s1148_s10  ;;  %s1272_s30 = smov [#allocation7]  }
 0x2e0   : > { %s1152_s7 = sshll.u32 %s1272_s30, 4  ;;  %s1153_s7 = int_to_ptr.vmem [resolvable:$false] %s1152_s7 }
 0x2e1   : > { %p1150_p2 = pnand %p1149_p10, %p1992_p11  ;;  %s1154_s9 = scalar_lea.vmem %s1153_s7, 4096 }
 0x2e2   : > { %p1155_p5 = scmp.lt.s32.totalorder %s1890_s6, %s1153_s7  ;;  %p1156_p6 = scmp.lt.s32.totalorder %s1154_s9, %s1148_s10 }
 0x2e3   : > { %p1151_p3 = pneg %p1150_p2 }
 0x2e4   : > { %p1157_p7 = por %p1156_p6, %p1155_p5 }
 0x2e6   : > { %p1158_p9 = pnand %p1157_p7, %p1151_p3 }
 0x2e8   : > { %1161 = shalt.err (!%p1158_p9)
}
 0x2e9   : > { %s1162_s26 = scalar_lea.hbm %s1887_s24, 2048  ;;  %s1166_s12 = scalar_lea.hbm %s1978_s2, 4096 }
 0x2ea   : > { %p1163_p12 = scmp.ne.s32.totalorder %s1887_s24, %s1162_s26  ;;  %p1167_p13 = scmp.lt.u32.totalorder %s1887_s24, %s1978_s2 }
 0x2eb   : > { %p1168_p1 = scmp.lt.u32.totalorder %s1166_s12, %s1162_s26  ;;  %p1170_p10 = scmp.lt.u32.totalorder %s1162_s26, %s1887_s24 }
 0x2ec   : > { %p1164_p0 = pnand %p1163_p12, %p1992_p11 }
 0x2ed   : > { %p1169_p8 = por %p1168_p1, %p1167_p13 }
 0x2ee   : > { %p1165_p4 = pneg %p1164_p0 }
 0x2ef   : > { %p1171_p2 = por %p1170_p10, %p1169_p8 }
 0x2f1   : > { %p1172_p3 = pnand %p1171_p2, %p1165_p4 }
 0x2f3   : > { %1175 = shalt.err (!%p1172_p3)
}
 0x2f4   : > { %s1273_s22 = smov 128   ;;  %s1274_s10 = smov 8  }
 0x2f5   : > { %950 = dma.vmem_to_hbm [thread:$0]  (%p1992_p11), %s1890_s6, 2048, %s1887_s24, %s730_s8, %s1273_s22, %s1273_s22, %s1274_s10  }
 0x2f6   : > { %s938_s30 = sshll.u32 %s1258_s18, 7  ;;  %s771_s7 = sshll.u32 %s1751_s13, 4  ;;  %s1926_s7 = int_to_ptr.vmem [resolvable:$true] %s771_s7 }
 0x2f7   : > { %s1924_s5 = scalar_lea.hbm %s1979_s3, %s938_s30  ;;  %s735_s11 = scalar_lea.sflag [#allocation9], %s1704_s29 }
 0x2f8   : > { %s1176_s12 = scalar_lea.vmem %s1926_s7, 2048  ;;  %s1275_s14 = smov [#allocation8]  }
 0x2f9   : > { %p1177_p5 = scmp.ne.s32.totalorder %s1926_s7, %s1176_s12  ;;  %s1180_s24 = sshll.u32 %s1275_s14, 4  ;;  %s1181_s24 = int_to_ptr.vmem [resolvable:$false] %s1180_s24 }
 0x2fa   : > { %s1182_s18 = scalar_lea.vmem %s1181_s24, 4096  ;;  %p1183_p9 = scmp.lt.s32.totalorder %s1926_s7, %s1181_s24 }
 0x2fb   : > { %p1178_p6 = pnand %p1177_p5, %p1992_p11  ;;  %p1184_p12 = scmp.lt.s32.totalorder %s1182_s18, %s1176_s12 }
 0x2fd   : > { %p1179_p7 = pneg %p1178_p6  ;;  %p1185_p0 = por %p1184_p12, %p1183_p9 }
 0x2ff   : > { %p1186_p4 = pnand %p1185_p0, %p1179_p7 }
 0x301   : > { %1189 = shalt.err (!%p1186_p4)
}
 0x302   : > { %s1190_s13 = scalar_lea.hbm %s1924_s5, 2048  ;;  %s1194_s21 = scalar_lea.hbm %s1979_s3, 4096 }
 0x303   : > { %p1191_p13 = scmp.ne.s32.totalorder %s1924_s5, %s1190_s13  ;;  %p1195_p10 = scmp.lt.u32.totalorder %s1924_s5, %s1979_s3 }
 0x304   : > { %p1196_p2 = scmp.lt.u32.totalorder %s1194_s21, %s1190_s13  ;;  %p1198_p5 = scmp.lt.u32.totalorder %s1190_s13, %s1924_s5 }
 0x305   : > { %p1192_p1 = pnand %p1191_p13, %p1992_p11 }
 0x306   : > { %p1197_p3 = por %p1196_p2, %p1195_p10 }
 0x307   : > { %p1193_p8 = pneg %p1192_p1 }
 0x308   : > { %p1199_p6 = por %p1198_p5, %p1197_p3 }
 0x30a   : > { %p1200_p7 = pnand %p1199_p6, %p1193_p8 }
 0x30c   : > { %1203 = shalt.err (!%p1200_p7)
}
 0x30d   : > { %s1276_s26 = smov 256  }
 0x30e   : > { %951 = dma.vmem_to_hbm [thread:$0]  (%p1992_p11), %s1926_s7, 2048, %s1924_s5, %s735_s11, %s1273_s22, %s1276_s26, %s1274_s10  }
 0x30f PF: > { %p972_p9 = scmp.ge.s32.totalorder %s1266_s20, 2  ;;  %s791_s12 = sand.u32 1, %s1246_s15  }
 0x310   : > { %p1993_p12 = scmp.ne.s32.totalorder %s1986_s27, 0  ;;  %s792_s14 = scalar_lea.sflag [#allocation4], %s791_s12 }
 0x312   : > { %p962_p0 = pnand %p972_p9, %p1993_p12 }
 0x314   : > { %1237 = dma.done.wait (!%p962_p0), %s792_s14, 2048  }
 0x315   : > { %1239 = vsyncadd (!%p962_p0), %s792_s14, 4294965248  ;;  %s801_s24 = scalar_lea.sflag [#allocation9], %s791_s12 }
 0x316   : > { %1241 = dma.done.wait (!%p962_p0), %s801_s24, 2048  }
 0x317   : > { %1243 = vsyncadd (!%p962_p0), %s801_s24, 4294965248  ;;  %s23_s20 = sadd.s32 1, %s1266_s20   ;;  %s1994_s15 = smov %s1250_s16 }
 0x318   : > { %p20_p4 = scmp.ge.s32.totalorder %s23_s20, 4   ;;  %s1995_s16 = smov %s1254_s17 }
 0x319   : > { %s1996_s17 = smov %s1355_s28  ;;  %s1997_s18 = smov %s1262_s19 }
 0x31a   : > { %s1998_s19 = smov %s2000_s23  ;;  %22 = sbr.rel (!%p20_p4) target bundleno = 8 (0x8), region = 108 }
 0x321   :  { %815 = vsyncpa [#allocation3], 1 }
 0x322   :  { %817 = vsyncpa [#allocation3 + $0x1], 1 }
 0x323   :  { %818 = vsyncpa [#allocation6], 1 }
 0x324   :  { %819 = vsyncpa [#allocation4], 1 }
 0x325   :  { %821 = vsyncpa [#allocation4 + $0x1], 1 }
 0x326   :  { %822 = vsyncpa [#allocation9], 1 }
 0x327   :  { %824 = vsyncpa [#allocation9 + $0x1], 1 }

</bundles_post_ra>
